<compile_context>
chip_gen: v7x
topology: tpu7x:2x2x1
jax: 0.10.0
libtpu: 0.0.40
codegen_flags: <defaults>
</compile_context>

<pallas_src>
import jax
import jax.numpy as jnp
from jax import lax
from jax.experimental import pallas as pl
from jax.experimental.pallas import tpu as pltpu

_LANES = 128
_SUBLANES = 8
_VMEM_LIMIT = 48 * 1024 * 1024


def _leaky_relu(x, slope):
    return jnp.where(x >= 0, x, slope * x)


def _segmented_group_sum(v, group):
    """Sum over aligned lane groups of size `group` (power of two dividing 128),
    broadcast back to every lane of its group.  XOR-butterfly built from lane
    rotations; the rotation sign convention is detected from a rolled iota so
    the code does not depend on pltpu.roll's direction."""
    if group == 1:
        return v
    assert group & (group - 1) == 0 and _LANES % group == 0
    n = v.shape[-1]
    lane = lax.broadcasted_iota(jnp.int32, (1, n), 1)
    k = 1
    while k < group:
        q = pltpu.roll(lane, shift=k, axis=1)
        take_pos = q == jnp.bitwise_xor(lane, k)          # picks v[l ^ k]
        p_pos = pltpu.roll(v, shift=k, axis=1)
        p_neg = pltpu.roll(v, shift=n - k, axis=1)
        v = v + jnp.where(take_pos, p_pos, p_neg)
        k *= 2
    return v


def _make_reduce_kernel(flat, group, slope):
    """Per-tile partial sum of a = LeakyReLU(conv1(x))."""
    def kernel(x_ref, w1_ref, o_ref):
        x = x_ref[...].astype(jnp.float32)                # (tile, L)
        u = x * w1_ref[...].astype(jnp.float32)           # (1, L) broadcast
        if flat:
            t = _segmented_group_sum(u, group)            # per-pixel t on all C lanes of its group
        else:
            t = jnp.sum(u, axis=1, keepdims=True)         # (tile, 1)
        a = _leaky_relu(t, slope)
        partial = jnp.sum(jnp.sum(a, axis=1, keepdims=True), axis=0, keepdims=True)
        o_ref[...] = partial                              # (1, 1)
    return kernel


def _make_apply_kernel(flat, group, slope):
    """out = LeakyReLU(conv1(x)) * sv[b]  (a recomputed; y never materialized)."""
    def kernel(x_ref, w1_ref, sv_ref, o_ref):
        x = x_ref[...].astype(jnp.float32)                # (tile, L)
        u = x * w1_ref[...].astype(jnp.float32)
        if flat:
            a = _leaky_relu(_segmented_group_sum(u, group), slope)      # (tile, L)
        else:
            a = _leaky_relu(jnp.sum(u, axis=1, keepdims=True), slope)   # (tile, 1)
        o_ref[...] = (a * sv_ref[...].astype(jnp.float32)).astype(o_ref.dtype)
    return kernel


def _pick_tile_rows(total_rows, row_bytes, target_bytes):
    """Largest row count dividing total_rows that is a multiple of 8 (or the
    full extent) and keeps one block at or under target_bytes."""
    if total_rows * row_bytes <= target_bytes:
        return total_rows
    divisors = [d for d in range(_SUBLANES, total_rows, _SUBLANES)
                if total_rows % d == 0]
    fitting = [d for d in divisors if d * row_bytes <= target_bytes]
    if fitting:
        return fitting[-1]
    if divisors:
        # TODO(synk): a ragged last tile (pl.BoundedSlice + in-kernel masking)
        # would avoid degenerate tiny divisors for awkward H*W.
        return divisors[0]
    return total_rows


def channel_attention_block(x, w1_conv, w2_conv, *, negative_slope=0.01,
                            block_bytes=4 * 1024 * 1024):
    """x: (B, H, W, C) BHWC.  w1_conv: (1, C, 1, 1) conv1 weight,
    w2_conv: (C, 1, 1, 1) conv2 weight (PyTorch Conv2d layouts)."""
    B, H, W, C = x.shape
    HW = H * W

    w1 = w1_conv.reshape(C).astype(jnp.float32)
    w2 = w2_conv.reshape(C).astype(jnp.float32)

    # Lane-dense "flat" view whenever channel groups tile the 128-lane vreg.
    flat = (C < _LANES) and (_LANES % C == 0) and ((HW * C) % _LANES == 0)
    if flat:
        L = _LANES
        group = C
        rows = (HW * C) // _LANES
        reps = _LANES // C
        w1_row = jnp.tile(w1.reshape(1, C), (1, reps))     # (1, 128), w1[l % C]
        count_per_pixel = C        # each pixel's `a` appears on C lanes
    else:
        L = C
        group = 1
        rows = HW
        w1_row = w1.reshape(1, C)
        count_per_pixel = 1

    x2 = x.reshape(B, rows, L)     # pure reshape: no HBM transpose / copy

    lane_padded = ((L + _LANES - 1) // _LANES) * _LANES    # VMEM pads lanes to 128
    tile = _pick_tile_rows(rows, lane_padded * 4, block_bytes)
    n_tiles = rows // tile
    assert tile * n_tiles == rows

    grid = (B, n_tiles)
    x_spec = pl.BlockSpec((None, tile, L), lambda b, t: (b, t, 0))
    w1_spec = pl.BlockSpec((1, L), lambda b, t: (0, 0))
    compiler_params = pltpu.CompilerParams(
        dimension_semantics=("parallel", "parallel"),
        vmem_limit_bytes=_VMEM_LIMIT,
    )

    # Pass 1: per-tile partial sums of a = LeakyReLU(x . w1).
    partials = pl.pallas_call(
        _make_reduce_kernel(flat, group, negative_slope),
        out_shape=jax.ShapeDtypeStruct((B, n_tiles, 1, 1), jnp.float32),
        grid_spec=pltpu.PrefetchScalarGridSpec(
            num_scalar_prefetch=0,
            grid=grid,
            in_specs=[x_spec, w1_spec],
            out_specs=pl.BlockSpec((None, None, 1, 1), lambda b, t: (b, t, 0, 0)),
        ),
        compiler_params=compiler_params,
    )(x2, w1_row)

    # Tiny per-batch squeeze/excite branch, algebraically folded (plain JAX).
    mean_a = jnp.sum(partials.reshape(B, n_tiles), axis=1) / (HW * count_per_pixel)
    z = mean_a * jnp.sum(w1 * w2)                               # (B,)
    zl = jnp.where(z >= 0, z, negative_slope * z)
    sv = jax.nn.sigmoid(zl[:, None] * w2[None, :]) * w2[None, :]  # (B, C) = s * w2
    if flat:
        sv_row = jnp.tile(sv, (1, reps)).reshape(B, 1, L)
    else:
        sv_row = sv.reshape(B, 1, L)

    # Pass 2: out = a * sv  (a recomputed per tile; y never materialized).
    out2 = pl.pallas_call(
        _make_apply_kernel(flat, group, negative_slope),
        out_shape=jax.ShapeDtypeStruct((B, rows, L), x.dtype),
        grid_spec=pltpu.PrefetchScalarGridSpec(
            num_scalar_prefetch=0,
            grid=grid,
            in_specs=[
                x_spec,
                w1_spec,
                pl.BlockSpec((None, 1, L), lambda b, t: (b, 0, 0)),
            ],
            out_specs=pl.BlockSpec((None, tile, L), lambda b, t: (b, t, 0)),
        ),
        compiler_params=compiler_params,
    )(x2, w1_row, sv_row)

    return out2.reshape(B, H, W, C)


def _reference(x, w1_conv, w2_conv, negative_slope=0.01):
    """Pure-JAX mirror of the PyTorch forward (BHWC in/out)."""
    B, H, W, C = x.shape
    w1 = w1_conv.reshape(C).astype(jnp.float32)
    w2 = w2_conv.reshape(C).astype(jnp.float32)
    xf = x.astype(jnp.float32)
    t = jnp.einsum('bhwc,c->bhw', xf, w1)
    a = jnp.where(t >= 0, t, negative_slope * t)
    y = a[..., None] * w2                                   # (B,H,W,C)
    m = jnp.mean(y, axis=(1, 2))                            # (B,C)
    z = jnp.einsum('bc,c->b', m, w1)
    zl = jnp.where(z >= 0, z, negative_slope * z)
    s = jax.nn.sigmoid(zl[:, None] * w2[None, :])           # (B,C)
    return (s[:, None, None, :] * y).astype(x.dtype)


def _run_case(key, B, H, W, C, block_bytes):
    kx, k1, k2 = jax.random.split(key, 3)
    x = jax.random.normal(kx, (B, H, W, C), dtype=jnp.float32)
    # nn.Conv2d weight shapes: conv1 (1, C, 1, 1), conv2 (C, 1, 1, 1), no bias.
    w1_conv = jax.random.normal(k1, (1, C, 1, 1), dtype=jnp.float32) * 0.5
    w2_conv = jax.random.normal(k2, (C, 1, 1, 1), dtype=jnp.float32) * 0.5
    out = channel_attention_block(x, w1_conv, w2_conv, block_bytes=block_bytes)
    out = jax.block_until_ready(out)
    ref = _reference(x, w1_conv, w2_conv)
    assert out.shape == (B, H, W, C)
    assert jnp.allclose(out, ref, atol=2e-5, rtol=2e-5), \
        f"mismatch vs reference for shape {(B, H, W, C)}"


if __name__ == "__main__":
    key = jax.random.PRNGKey(0)
    k0, k1, k2 = jax.random.split(key, 3)

    # Lane-dense path (C | 128), single tile per batch.
    _run_case(k0, B=2, H=16, W=16, C=4, block_bytes=4 * 1024 * 1024)
    # Lane-dense path, many tiles per batch (tiny block budget forces 8 tiles):
    # exercises multi-tile partial-sum reduction and per-batch sv reuse.
    _run_case(k1, B=2, H=32, W=32, C=8, block_bytes=4096)
    # Generic fallback path (C does not divide 128).
    _run_case(k2, B=2, H=8, W=8, C=6, block_bytes=4 * 1024 * 1024)

    print("KERNEL_OK")
</pallas_src>

<mosaic_0001>
module attributes {stable_mosaic.version = 11 : i64} {
  func.func @kernel(%arg0: i32, %arg1: i32, %arg2: memref<1x8x128xf32, #tpu.memory_space<vmem>>, %arg3: memref<1x128xf32, #tpu.memory_space<vmem>>, %arg4: memref<1x1x1x1xf32, #tpu.memory_space<vmem>>) attributes {dimension_semantics = [#tpu.dimension_semantics<parallel>, #tpu.dimension_semantics<parallel>], iteration_bounds = array<i64: 2, 1>, scalar_prefetch = 0 : i64, scratch_operands = 0 : i64, tpu.core_type = #tpu.core_type<tc>, window_params = [{transform_indices = @transform_0, window_bounds = array<i64: 1, 8, 128>}, {pipeline_mode = #tpu.pipeline_mode<synchronous>, transform_indices = @transform_1, window_bounds = array<i64: 1, 128>}, {transform_indices = @transform_2, window_bounds = array<i64: 1, 1, 1, 1>}]} {
    %c0 = arith.constant 0 : index
    %c0_0 = arith.constant 0 : index
    %c0_1 = arith.constant 0 : index
    %0 = vector.load %arg2[%c0, %c0_0, %c0_1] : memref<1x8x128xf32, #tpu.memory_space<vmem>>, vector<1x8x128xf32>
    %1 = vector.shape_cast %0 : vector<1x8x128xf32> to vector<8x128xf32>
    %c0_2 = arith.constant 0 : index
    %c0_3 = arith.constant 0 : index
    %2 = vector.load %arg3[%c0_2, %c0_3] : memref<1x128xf32, #tpu.memory_space<vmem>>, vector<1x128xf32>
    %3 = vector.broadcast %2 : vector<1x128xf32> to vector<8x128xf32>
    %4 = arith.mulf %1, %3 : vector<8x128xf32>
    %5 = tpu.iota {dimensions = array<i32: 1>} : vector<1x128xi32>
    %c1_i32 = arith.constant 1 : i32
    %6 = tpu.dynamic_rotate %5 by %c1_i32 dim 1 : vector<1x128xi32>, i32 -> vector<1x128xi32>
    %c1_i32_4 = arith.constant 1 : i32
    %7 = vector.broadcast %c1_i32_4 : i32 to vector<1x128xi32>
    %8 = arith.xori %5, %7 : vector<1x128xi32>
    %9 = arith.cmpi eq, %6, %8 : vector<1x128xi32>
    %c1_i32_5 = arith.constant 1 : i32
    %10 = tpu.dynamic_rotate %4 by %c1_i32_5 dim 1 : vector<8x128xf32>, i32 -> vector<8x128xf32>
    %c127_i32 = arith.constant 127 : i32
    %11 = tpu.dynamic_rotate %4 by %c127_i32 dim 1 : vector<8x128xf32>, i32 -> vector<8x128xf32>
    %12 = vector.shape_cast %9 : vector<1x128xi1> to vector<1x128xi1>
    %13 = vector.broadcast %12 : vector<1x128xi1> to vector<8x128xi1>
    %14 = arith.select %13, %10, %11 : vector<8x128xi1>, vector<8x128xf32>
    %15 = arith.addf %4, %14 : vector<8x128xf32>
    %c2_i32 = arith.constant 2 : i32
    %16 = tpu.dynamic_rotate %5 by %c2_i32 dim 1 : vector<1x128xi32>, i32 -> vector<1x128xi32>
    %c2_i32_6 = arith.constant 2 : i32
    %17 = vector.broadcast %c2_i32_6 : i32 to vector<1x128xi32>
    %18 = arith.xori %5, %17 : vector<1x128xi32>
    %19 = arith.cmpi eq, %16, %18 : vector<1x128xi32>
    %c2_i32_7 = arith.constant 2 : i32
    %20 = tpu.dynamic_rotate %15 by %c2_i32_7 dim 1 : vector<8x128xf32>, i32 -> vector<8x128xf32>
    %c126_i32 = arith.constant 126 : i32
    %21 = tpu.dynamic_rotate %15 by %c126_i32 dim 1 : vector<8x128xf32>, i32 -> vector<8x128xf32>
    %22 = vector.shape_cast %19 : vector<1x128xi1> to vector<1x128xi1>
    %23 = vector.broadcast %22 : vector<1x128xi1> to vector<8x128xi1>
    %24 = arith.select %23, %20, %21 : vector<8x128xi1>, vector<8x128xf32>
    %25 = arith.addf %15, %24 : vector<8x128xf32>
    %cst = arith.constant 0.000000e+00 : f32
    %26 = vector.broadcast %cst : f32 to vector<8x128xf32>
    %27 = arith.cmpf oge, %25, %26 : vector<8x128xf32>
    %cst_8 = arith.constant 0.00999999977 : f32
    %28 = vector.broadcast %cst_8 : f32 to vector<8x128xf32>
    %29 = arith.mulf %28, %25 : vector<8x128xf32>
    %30 = arith.select %27, %25, %29 : vector<8x128xi1>, vector<8x128xf32>
    %cst_9 = arith.constant dense<0.000000e+00> : vector<8xf32>
    %31 = vector.multi_reduction <add>, %30, %cst_9 [1] : vector<8x128xf32> to vector<8xf32>
    %32 = vector.shape_cast %31 : vector<8xf32> to vector<8x1xf32>
    %cst_10 = arith.constant dense<0.000000e+00> : vector<1xf32>
    %33 = vector.multi_reduction <add>, %32, %cst_10 [0] : vector<8x1xf32> to vector<1xf32>
    %34 = vector.shape_cast %33 : vector<1xf32> to vector<1x1xf32>
    %c0_11 = arith.constant 0 : index
    %c0_12 = arith.constant 0 : index
    %c0_13 = arith.constant 0 : index
    %c0_14 = arith.constant 0 : index
    %35 = vector.load %arg4[%c0_11, %c0_12, %c0_13, %c0_14] : memref<1x1x1x1xf32, #tpu.memory_space<vmem>>, vector<1x1x1x1xf32>
    %36 = vector.shape_cast %35 : vector<1x1x1x1xf32> to vector<1x1xf32>
    %37 = vector.shape_cast %34 : vector<1x1xf32> to vector<1x1x1x1xf32>
    tpu.vector_store %arg4[%c0_11, %c0_12, %c0_13, %c0_14], %37 {strides = array<i32>} : memref<1x1x1x1xf32, #tpu.memory_space<vmem>>, vector<1x1x1x1xf32>,
    return
  }
  func.func @transform_0(%arg0: i32, %arg1: i32) -> (i32, i32, i32) {
    %c0_i32 = arith.constant 0 : i32
    %c0_i32_0 = arith.constant 0 : i32
    return %arg0, %arg1, %c0_i32 : i32, i32, i32
  }
  func.func @transform_1(%arg0: i32, %arg1: i32) -> (i32, i32) {
    %c0_i32 = arith.constant 0 : i32
    %c0_i32_0 = arith.constant 0 : i32
    %c0_i32_1 = arith.constant 0 : i32
    return %c0_i32, %c0_i32_0 : i32, i32
  }
  func.func @transform_2(%arg0: i32, %arg1: i32) -> (i32, i32, i32, i32) {
    %c0_i32 = arith.constant 0 : i32
    %c0_i32_0 = arith.constant 0 : i32
    %c0_i32_1 = arith.constant 0 : i32
    return %arg0, %arg1, %c0_i32, %c0_i32_0 : i32, i32, i32, i32
  }
}

</mosaic_0001>

<bundles_post_ra>
// kernel: tpu_custom_call.1
= control target key start
LH: loop header
LB: loop body
LE: loop exit
PB: predicated region body
PF: predicated region fallthrough
CT: control target
= control target key end

     0   :  { %7 = vsyncpa [#allocation3], 0  ;;  %s616_s0 = inlined_call_operand.hbm [shape: f32[2,8,128], index: 0, kind: input, shape index: {}]   ;;  %s617_s1 = inlined_call_operand.vmem [shape: f32[1,128], index: 1, kind: input, shape index: {}]   ;;  %s618_s2 = inlined_call_operand.vmem [shape: f32[2,1,1,1], index: 2, kind: output, shape index: {}]  }
   0x1   :  { %9 = vsyncpa [#allocation3 + $0x1], 0  ;;  %s488_s9 = smov 0   ;;  %s490_s10 = smov 0  }
   0x2   :  { %s492_s11 = smov 0   ;;  %s494_s12 = smov 0  }
   0x3   :  { %s496_s13 = smov 0   ;;  %s498_s14 = smov 0  }
   0x4 LB: > { %s314_s15 = sadd.s32 4294967295, %s465_s14   ;;  %s27_s16 = sadd.s32 1, %s461_s13  ;;  %s465_s14 = sphi %s498_s14, %s15_s14   ;;  %s461_s13 = sphi %s496_s13, %s628_s13   ;;  %s457_s12 = sphi %s494_s12, %s627_s12   ;;  %s453_s11 = sphi %s492_s11, %s626_s11   ;;  %s449_s10 = sphi %s490_s10, %s625_s10   ;;  %s445_s9 = sphi %s488_s9, %s624_s9  }
   0x5   : > { %p29_p0 = scmp.ge.s32.totalorder %s27_s16, 2  ;;  %s36_s17 = sadd.s32 1, %s453_s11 }
   0x6   : > { %p43_p1 = scmp.ne.s32.totalorder %s453_s11, %s449_s10  ;;  %p44_p2 = scmp.eq.s32.totalorder %s465_s14, 0 }
   0x7   : > { %s630_s16 = smov (%p29_p0, %s27_s16), 0  ;;  %p49_p4 = scmp.ne.s32.totalorder %s449_s10, %s445_s9 }
   0x8   : > { %p524_p3 = por %p44_p2, %p43_p1  ;;  %s31_s19 = ssub.s32 %s461_s13, %s630_s16 }
   0x9   : > { %p50_p5 = scmp.eq.s32.totalorder %s314_s15, 0  ;;  %p34_p6 = scmp.eq.s32.totalorder %s31_s19, 0 }
   0xa   : > { %p331_p8 = scmp.lt.s32.totalorder %s465_s14, 2  ;;  %s125_s22 = sand.u32 1, %s453_s11  }
   0xb   : > { %p531_p7 = por %p50_p5, %p49_p4  ;;  %s319_s23 = sshll.u32 %s461_s13, 7 }
   0xc   : > { %s537_s21 = scalar_select %p34_p6, %s453_s11, %s36_s17  }
   0xd   : > { %s318_s24 = sshll.u32 %s125_s22, 3  ;;  %s544_s27 = scalar_lea.hbm %s616_s0, %s319_s23 }
   0xe   : > { %s129_s28 = scalar_lea.vmem [#allocation2], %s318_s24  ;;  %p548_p9 = pnand %p331_p8, %p524_p3 }
   0xf   : > { %s137_s29 = sshll.u32 %s129_s28, 4  ;;  %s126_s3 = scalar_lea.sflag [#allocation3], %s125_s22  ;;  %s552_s29 = int_to_ptr.vmem [resolvable:$true] %s137_s29 }
  0x10   : > { %s385_s4 = scalar_lea.hbm %s544_s27, 128  ;;  %p387_p13 = pneg %p548_p9 }
  0x11   : > { %p386_p12 = scmp.ne.s32.totalorder %s544_s27, %s385_s4  ;;  %s390_s7 = scalar_lea.hbm %s616_s0, 256 }
  0x12   : > { %p391_p2 = scmp.lt.u32.totalorder %s544_s27, %s616_s0  ;;  %p392_p3 = scmp.lt.u32.totalorder %s390_s7, %s385_s4 }
  0x13   : > { %p388_p0 = pnand %p387_p13, %p386_p12  ;;  %p394_p5 = scmp.lt.u32.totalorder %s385_s4, %s544_s27 }
  0x14   : > { %p393_p4 = por %p392_p3, %p391_p2 }
  0x15   : > { %p389_p1 = pneg %p388_p0 }
  0x16   : > { %p395_p6 = por %p394_p5, %p393_p4 }
  0x18   : > { %p396_p8 = pnand %p395_p6, %p389_p1 }
  0x1a   : > { %399 = shalt.err (!%p396_p8)
}
  0x1b   : > { %s400_s15 = scalar_lea.vmem %s552_s29, 128  ;;  %s467_s17 = smov [#allocation2]  }
  0x1c   : > { %p401_p12 = scmp.ne.s32.totalorder %s552_s29, %s400_s15  ;;  %s405_s18 = sshll.u32 %s467_s17, 4  ;;  %s406_s18 = int_to_ptr.vmem [resolvable:$false] %s405_s18 }
  0x1d   : > { %s407_s19 = scalar_lea.vmem %s406_s18, 256  ;;  %p408_p11 = scmp.lt.s32.totalorder %s552_s29, %s406_s18 }
  0x1e   : > { %p403_p0 = pnand %p401_p12, %p387_p13  ;;  %p409_p2 = scmp.lt.s32.totalorder %s407_s19, %s400_s15 }
  0x20   : > { %p404_p10 = pneg %p403_p0  ;;  %p410_p3 = por %p409_p2, %p408_p11 }
  0x22   : > { %p411_p4 = pnand %p410_p3, %p404_p10 }
  0x24   : > { %414 = shalt.err (!%p411_p4)
}
  0x25   : > { %330 = dma.hbm_to_vmem [thread:$0]  (!%p548_p9), %s544_s27, 128, %s552_s29, %s126_s3  }
  0x26   : > { %p622_p1 = scmp.lt.s32.totalorder %s465_s14, 3  ;;  %p623_p5 = scmp.ge.s32.totalorder %s465_s14, 1 }
  0x28   : > { %p143_p13 = pnand %p623_p5, %p622_p1 }
  0x29   : > { %s148_s22 = sand.u32 (!%p143_p13), 1, %s449_s10  }
  0x2a   : > { %146 = sbr.rel (%p143_p13) target bundleno = 453 (0x1c5), region = 28  ;;  %s321_s23 = sshll.u32 (!%p143_p13), %s148_s22, 3 }
  0x2b   : > { %s149_s24 = scalar_lea.sflag (!%p143_p13), [#allocation3], %s148_s22  ;;  %s152_s25 = scalar_lea.vmem (!%p143_p13), [#allocation2], %s321_s23 }
  0x31   : > { %440 = dma.done.wait (%p531_p7), %s149_s24, 128  }
  0x32   : > { %442 = vsyncadd (%p531_p7), %s149_s24, 4294967168  ;;  %v189_v0 = vlaneseq  ;;  %s468_s26 = smov 1   ;;  %v180_v2 = vld [vmem:[%s152_s25] sm:$0xff]  ;;  %s469_s29 = smov 127   ;;  %v471_v9 = vmov 0   ;;  %vm234_vm5 = vcmask 0  }
  0x33   : > { %v322_v3 = vld [vmem:[%s617_s1] ss:$0 sm:$0xff]  ;;  %s470_s30 = smov 2   ;;  %s472_s20 = smov 126  }
  0x34   : > { %v190_v1 = vand.u32 127, %v189_v0  ;;  %v188_v4 = vmul.f32 %v322_v3, %v180_v2  ;;  %v201_v5 = vshrl.u32 %v189_v0, 7  ;;  %p174_p7 = scmp.lt.s32.totalorder %s457_s12, 1 }
  0x36   : > { %191 = vrot.lane.b32.xlu0 %v190_v1, %s468_s26  ;;  %197 = vrot.lane.b32.xlu1 %v188_v4, %s469_s29  ;;  %v193_v6 = vxor.u32 1, %v190_v1  ;;  %v202_v7 = vsub.s32 0, %v201_v5  ;;  %v209_v15 = vxor.u32 2, %v190_v1  ;;  %s632_s12 = smov (!%p174_p7, %s457_s12), 1 }
  0x37   : > { %s179_s5 = scalar_lea.vmem %s618_s2, %s632_s12 }
  0x3a   : > { %195 = vrot.lane.b32.xlu0 %v188_v4, %s468_s26  ;;  %207 = vrot.lane.b32.xlu1 %v190_v1, %s470_s30 }
  0xa8   : > { %v192_v8 = vpop.permute.xlu0 %191  ;;  %v198_v12 = vpop.permute.xlu1 %197 }
  0xa9   : > { %vm194_vm0 = vcmp.eq.s32.totalorder %v192_v8, %v193_v6 }
  0xaa   : > { %v199_v10 = vsel %vm194_vm0, 1, %v471_v9 }
  0xab   : > { %v203_v11 = vrot.slane %v199_v10, %v202_v7 }
  0xac   : > { %v196_v13 = vpop.permute.xlu0 %195  ;;  %v208_v17 = vpop.permute.xlu1 %207 }
  0xad   : > { %vm204_vm1 = vcmp.eq.s32.totalorder %v203_v11, 1  ;;  %vm210_vm2 = vcmp.eq.s32.totalorder %v208_v17, %v209_v15 }
  0xae   : > { %v205_v14 = vsel %vm204_vm1, %v196_v13, %v198_v12  ;;  %v215_v18 = vsel %vm210_vm2, 1, %v471_v9 }
  0xaf   : > { %v206_v16 = vadd.f32 %v205_v14, %v188_v4  ;;  %v219_v19 = vrot.slane %v215_v18, %v202_v7 }
  0xb1   : > { %213 = vrot.lane.b32.xlu1 %v206_v16, %s472_s20  ;;  %211 = vrot.lane.b32.xlu0 %v206_v16, %s470_s30  ;;  %vm220_vm3 = vcmp.eq.s32.totalorder %v219_v19, 1 }
 0x123   : > { %v214_v20 = vpop.permute.xlu1 %213  ;;  %v212_v21 = vpop.permute.xlu0 %211 }
 0x124   : > { %v221_v22 = vsel %vm220_vm3, %v212_v21, %v214_v20 }
 0x125   : > { %v222_v23 = vadd.f32 %v221_v22, %v206_v16 }
 0x127   : > { %vm223_vm4 = vcmp.ge.f32.partialorder %v222_v23, 0.0  ;;  %v224_v24 = vmul.f32 0.01, %v222_v23 }
 0x129   : > { %v225_v25 = vsel %vm223_vm4, %v222_v23, %v224_v24 }
 0x12a   : > { %226 = vadd.xlane.f32.xlu0 %v225_v25 }
 0x1b7   : > { %v227_v26 = vpop.xlane.xlu0 %226 }
 0x1b8   : > { %v228_v27 = vrot.slane %v227_v26, 4 }
 0x1ba   : > { %v229_v28 = vadd.f32 %v228_v27, %v227_v26 }
 0x1bc   : > { %v230_v29 = vrot.slane %v229_v28, 2 }
 0x1be   : > { %v231_v30 = vadd.f32 %v230_v29, %v229_v28 }
 0x1c0   : > { %v232_v31 = vrot.slane %v231_v30, 1 }
 0x1c2   : > { %v233_v32 = vadd.f32 %v232_v31, %v231_v30 }
 0x1c4   : > { %235 = vst.msk [vmem:[%s179_s5] sm:$0x1] %vm234_vm5, %v233_v32 }
 0x1c5 PF: > { %s15_s14 = sadd.s32 1, %s465_s14   ;;  %s624_s9 = smov %s449_s10 }
 0x1c6   : > { %p12_p9 = scmp.ge.s32.totalorder %s15_s14, 4   ;;  %s625_s10 = smov %s453_s11 }
 0x1c7   : > { %s626_s11 = smov %s537_s21  ;;  %s627_s12 = smov %s461_s13 }
 0x1c8   : > { %s628_s13 = smov %s630_s16  ;;  %14 = sbr.rel (!%p12_p9) target bundleno = 4 (0x4), region = 68 }
 0x1cf   :  { %259 = vsyncpa [#allocation3], 1 }
 0x1d0   :  { %261 = vsyncpa [#allocation3 + $0x1], 1 }

</bundles_post_ra>
